<compile_context>
chip_gen: v6e
topology: v6e:2x2x1
jax: 0.10.0
libtpu: 0.0.40
codegen_flags: <defaults>
</compile_context>

<pallas_src>
import jax
import jax.numpy as jnp
from jax import lax
from jax.experimental import pallas as pl
from jax.experimental.pallas import tpu as pltpu

EMBEDDING_DIM = 32
HEAD_SIZE = 16


def head_kernel(x_ref, wqkv_ref, o_ref):
    # x_ref:    (bb, T, C)   a block of batch elements
    # wqkv_ref: (C, 3H)      fused [Wq | Wk | Wv]
    # o_ref:    (bb, T, H)
    bb, T, C = x_ref.shape
    H = o_ref.shape[-1]

    # Fused QKV projection: one (bb*T, C) x (C, 3H) matmul on the MXU.
    x2d = x_ref[...].reshape(bb * T, C)
    qkv = jnp.dot(x2d, wqkv_ref[...], preferred_element_type=jnp.float32)  # (bb*T, 3H)
    qkv = qkv.reshape(bb, T, 3 * H)
    q = qkv[:, :, 0:H]
    k = qkv[:, :, H:2 * H]
    v = qkv[:, :, 2 * H:3 * H]

    # Scaled attention scores: batched q @ k^T without materializing k.T.
    scale = jnp.float32(C) ** -0.5
    scores = lax.dot_general(
        q, k, (((2,), (2,)), ((0,), (0,))),
        preferred_element_type=jnp.float32) * scale                        # (bb, T, T)

    # Causal mask built in-kernel (keep row >= col); NaN-safe big-negative fill.
    row = lax.broadcasted_iota(jnp.int32, (T, T), 0)
    col = lax.broadcasted_iota(jnp.int32, (T, T), 1)
    causal = (row >= col)[None, :, :]
    scores = jnp.where(causal, scores, jnp.float32(-1e30))

    # Numerically stable softmax along the last axis.
    m = jnp.max(scores, axis=-1, keepdims=True)
    p = jnp.exp(scores - m)
    p = p * pl.reciprocal(jnp.sum(p, axis=-1, keepdims=True), approx=True)

    # Batched probs @ v on the MXU.
    out = lax.dot_general(
        p, v, (((2,), (1,)), ((0,), (0,))),
        preferred_element_type=jnp.float32)                                # (bb, T, H)
    o_ref[...] = out.astype(o_ref.dtype)


def head_forward(x, wq, wk, wv):
    """x: (B, T, C); wq/wk/wv: (C, H) -> returns (B, T, H)."""
    B, T, C = x.shape
    H = wq.shape[1]

    # Fuse projection weights once: (C, 3H) = [Wq | Wk | Wv].
    wqkv = jnp.concatenate([wq, wk, wv], axis=1)

    # At most 2 batch blocks: one per v7x TensorCore; 1-2 grid steps elsewhere.
    batch_blocks = 2 if (B >= 2 and B % 2 == 0) else 1
    bb = B // batch_blocks

    return pl.pallas_call(
        head_kernel,
        out_shape=jax.ShapeDtypeStruct((B, T, H), x.dtype),
        grid_spec=pltpu.PrefetchScalarGridSpec(
            num_scalar_prefetch=0,
            grid=(batch_blocks,),
            in_specs=[
                pl.BlockSpec((bb, T, C), lambda i: (i, 0, 0)),
                pl.BlockSpec((C, 3 * H), lambda i: (0, 0)),
            ],
            out_specs=pl.BlockSpec((bb, T, H), lambda i: (i, 0, 0)),
        ),
        compiler_params=pltpu.CompilerParams(
            dimension_semantics=("parallel",)
        ),
    )(x, wqkv)


def head_reference(x, wq, wk, wv, tril):
    """Pure-JAX reference mirroring the PyTorch forward."""
    b, t, c = x.shape
    k = x @ wk
    q = x @ wq
    v = x @ wv
    weights = jnp.einsum("btd,bsd->bts", q, k) * (c ** -0.5)
    masked = jnp.where(tril[:t, :t] == 0.0, -jnp.inf, weights)
    probs = jax.nn.softmax(masked, axis=-1)
    return probs @ v


if __name__ == "__main__":
    key = jax.random.PRNGKey(0)
    kx, kk, kq, kv = jax.random.split(key, 4)

    B, T, C, H = 2, 8, EMBEDDING_DIM, HEAD_SIZE

    x = jax.random.normal(kx, (B, T, C), dtype=jnp.float32)
    # deterministic parameter init (nn.Linear-like uniform scale)
    bound = 1.0 / (C ** 0.5)
    wk = jax.random.uniform(kk, (C, H), minval=-bound, maxval=bound, dtype=jnp.float32)
    wq = jax.random.uniform(kq, (C, H), minval=-bound, maxval=bound, dtype=jnp.float32)
    wv = jax.random.uniform(kv, (C, H), minval=-bound, maxval=bound, dtype=jnp.float32)
    # PyTorch registers tril as (head_size, head_size); only used by the reference —
    # the kernel builds the equivalent causal mask in-kernel with iota (T <= head_size here).
    tril = jnp.tril(jnp.ones((H, H), dtype=jnp.float32))

    out = head_forward(x, wq, wk, wv)
    out = jax.block_until_ready(out)

    ref = head_reference(x, wq, wk, wv, tril)
    assert out.shape == (B, T, H)
    # slightly looser tolerance than exact divide due to approx reciprocal (EUP vrcp)
    assert jnp.allclose(out, ref, atol=2e-3, rtol=2e-3), "mismatch vs reference"

    print("KERNEL_OK")
</pallas_src>

<mosaic_0001>
module attributes {stable_mosaic.version = 11 : i64} {
  func.func @head_kernel(%arg0: i32, %arg1: memref<1x8x32xf32, #tpu.memory_space<vmem>>, %arg2: memref<32x48xf32, #tpu.memory_space<vmem>>, %arg3: memref<1x8x16xf32, #tpu.memory_space<vmem>>) attributes {dimension_semantics = [#tpu.dimension_semantics<parallel>], iteration_bounds = array<i64: 2>, scalar_prefetch = 0 : i64, scratch_operands = 0 : i64, tpu.core_type = #tpu.core_type<tc>, window_params = [{transform_indices = @transform_0, window_bounds = array<i64: 1, 8, 32>}, {pipeline_mode = #tpu.pipeline_mode<synchronous>, transform_indices = @transform_1, window_bounds = array<i64: 32, 48>}, {transform_indices = @transform_2, window_bounds = array<i64: 1, 8, 16>}]} {
    %c0 = arith.constant 0 : index
    %c0_0 = arith.constant 0 : index
    %c0_1 = arith.constant 0 : index
    %0 = vector.load %arg1[%c0, %c0_0, %c0_1] : memref<1x8x32xf32, #tpu.memory_space<vmem>>, vector<1x8x32xf32>
    %1 = vector.shape_cast %0 : vector<1x8x32xf32> to vector<8x32xf32>
    %c0_2 = arith.constant 0 : index
    %c0_3 = arith.constant 0 : index
    %2 = vector.load %arg2[%c0_2, %c0_3] : memref<32x48xf32, #tpu.memory_space<vmem>>, vector<32x48xf32>
    %cst = arith.constant dense<0.000000e+00> : vector<8x48xf32>
    %3 = tpu.matmul %1, %2, %cst {dimension_numbers = #tpu.dot_dimension_numbers<[1], [0], [0], [1], [0, 0, 1, 1], [], []>} : vector<8x32xf32>, vector<32x48xf32>, vector<8x48xf32> -> vector<8x48xf32>
    %4 = vector.shape_cast %3 : vector<8x48xf32> to vector<1x8x48xf32>
    %5 = vector.extract_strided_slice %4 {offsets = [0, 0, 0], sizes = [1, 8, 16], strides = [1, 1, 1]} : vector<1x8x48xf32> to vector<1x8x16xf32>
    %6 = vector.extract_strided_slice %4 {offsets = [0, 0, 16], sizes = [1, 8, 16], strides = [1, 1, 1]} : vector<1x8x48xf32> to vector<1x8x16xf32>
    %7 = vector.extract_strided_slice %4 {offsets = [0, 0, 32], sizes = [1, 8, 16], strides = [1, 1, 1]} : vector<1x8x48xf32> to vector<1x8x16xf32>
    %cst_4 = arith.constant 3.200000e+01 : f32
    %cst_5 = arith.constant -5.000000e-01 : f32
    %8 = math.powf %cst_4, %cst_5 : f32
    %cst_6 = arith.constant dense<0.000000e+00> : vector<1x8x8xf32>
    %9 = tpu.matmul %5, %6, %cst_6 {dimension_numbers = #tpu.dot_dimension_numbers<[2], [2], [1], [1], [0, 0, 0, 1, 1, 1], [0], [0]>} : vector<1x8x16xf32>, vector<1x8x16xf32>, vector<1x8x8xf32> -> vector<1x8x8xf32>
    %10 = vector.broadcast %8 : f32 to vector<1x8x8xf32>
    %11 = arith.mulf %9, %10 : vector<1x8x8xf32>
    %12 = tpu.iota {dimensions = array<i32: 0>} : vector<8x8xi32>
    %13 = tpu.iota {dimensions = array<i32: 1>} : vector<8x8xi32>
    %14 = arith.cmpi sge, %12, %13 : vector<8x8xi32>
    %15 = vector.shape_cast %14 : vector<8x8xi1> to vector<1x8x8xi1>
    %cst_7 = arith.constant -1.000000e+30 : f32
    %16 = vector.broadcast %cst_7 : f32 to vector<1x8x8xf32>
    %17 = arith.select %15, %11, %16 : vector<1x8x8xi1>, vector<1x8x8xf32>
    %cst_8 = arith.constant dense<0xFF800000> : vector<1x8xf32>
    %18 = vector.multi_reduction <maximumf>, %17, %cst_8 [2] : vector<1x8x8xf32> to vector<1x8xf32>
    %19 = vector.shape_cast %18 : vector<1x8xf32> to vector<1x8x1xf32>
    %20 = vector.broadcast %19 : vector<1x8x1xf32> to vector<1x8x8xf32>
    %21 = arith.subf %17, %20 : vector<1x8x8xf32>
    %22 = math.exp %21 : vector<1x8x8xf32>
    %cst_9 = arith.constant dense<0.000000e+00> : vector<1x8xf32>
    %23 = vector.multi_reduction <add>, %22, %cst_9 [2] : vector<1x8x8xf32> to vector<1x8xf32>
    %24 = vector.shape_cast %23 : vector<1x8xf32> to vector<1x8x1xf32>
    %25 = tpu.reciprocal %24 {approx = true} : vector<1x8x1xf32> -> vector<1x8x1xf32>
    %26 = vector.broadcast %25 : vector<1x8x1xf32> to vector<1x8x8xf32>
    %27 = arith.mulf %22, %26 : vector<1x8x8xf32>
    %cst_10 = arith.constant dense<0.000000e+00> : vector<1x8x16xf32>
    %28 = tpu.matmul %27, %7, %cst_10 {dimension_numbers = #tpu.dot_dimension_numbers<[2], [1], [1], [2], [0, 0, 0, 1, 1, 2], [0], [0]>} : vector<1x8x8xf32>, vector<1x8x16xf32>, vector<1x8x16xf32> -> vector<1x8x16xf32>
    %c0_11 = arith.constant 0 : index
    %c0_12 = arith.constant 0 : index
    %c0_13 = arith.constant 0 : index
    %29 = vector.load %arg3[%c0_11, %c0_12, %c0_13] : memref<1x8x16xf32, #tpu.memory_space<vmem>>, vector<1x8x16xf32>
    tpu.vector_store %arg3[%c0_11, %c0_12, %c0_13], %28 {strides = array<i32>} : memref<1x8x16xf32, #tpu.memory_space<vmem>>, vector<1x8x16xf32>,
    return
  }
  func.func @transform_0(%arg0: i32) -> (i32, i32, i32) {
    %c0_i32 = arith.constant 0 : i32
    %c0_i32_0 = arith.constant 0 : i32
    %c0_i32_1 = arith.constant 0 : i32
    return %arg0, %c0_i32, %c0_i32_0 : i32, i32, i32
  }
  func.func @transform_1(%arg0: i32) -> (i32, i32) {
    %c0_i32 = arith.constant 0 : i32
    %c0_i32_0 = arith.constant 0 : i32
    %c0_i32_1 = arith.constant 0 : i32
    return %c0_i32, %c0_i32_0 : i32, i32
  }
  func.func @transform_2(%arg0: i32) -> (i32, i32, i32) {
    %c0_i32 = arith.constant 0 : i32
    %c0_i32_0 = arith.constant 0 : i32
    %c0_i32_1 = arith.constant 0 : i32
    return %arg0, %c0_i32, %c0_i32_0 : i32, i32, i32
  }
}

</mosaic_0001>

<bundles_post_ra>
// kernel: tpu_custom_call.1
= control target key start
LH: loop header
LB: loop body
LE: loop exit
PB: predicated region body
PF: predicated region fallthrough
CT: control target
= control target key end

     0   :  { %7 = vsyncpa [#allocation3], 0  ;;  %s963_s0 = inlined_call_operand.hbm [shape: f32[2,8,32], index: 0, kind: input, shape index: {}]   ;;  %s964_s1 = inlined_call_operand.hbm [shape: f32[32,48], index: 1, kind: input, shape index: {}]   ;;  %s965_s2 = inlined_call_operand.hbm [shape: f32[2,8,16], index: 2, kind: output, shape index: {}]  }
   0x1   :  { %9 = vsyncpa [#allocation3 + $0x1], 0 }
   0x2   :  { %10 = vsyncpa [#allocation6], 0 }
   0x3   :  { %11 = vsyncpa [#allocation4], 0 }
   0x4   :  { %13 = vsyncpa [#allocation4 + $0x1], 0  ;;  %s784_s9 = smov 0   ;;  %s786_s10 = smov 0  }
   0x5   :  { %s788_s11 = smov 0   ;;  %s790_s12 = smov 0  }
   0x6 LB: > { %s805_s13 = sadd.s32 4294967295, %s758_s12   ;;  %s521_s14 = sadd.s32 4294967294, %s758_s12   ;;  %s758_s12 = sphi %s790_s12, %s987_s12   ;;  %s754_s11 = sphi %s788_s11, %s986_s11   ;;  %s750_s10 = sphi %s786_s10, %s985_s10   ;;  %s746_s9 = sphi %s784_s9, %s984_s9  }
   0x7   : > { %p39_p0 = scmp.ne.s32.totalorder %s750_s10, %s746_s9  ;;  %p966_p1 = scmp.eq.s32.totalorder %s805_s13, 0 }
   0x8   : > { %p90_p3 = scmp.eq.s32.totalorder %s521_s14, 1  ;;  %p522_p5 = scmp.ge.s32.totalorder %s758_s12, 1 }
   0x9   : > { %p814_p4 = por %p966_p1, %p39_p0  ;;  %p97_p7 = scmp.lt.s32.totalorder %s758_s12, 3 }
   0xa   : > { %p819_p6 = por %p90_p3, %p39_p0  ;;  %s760_s18 = smov [#allocation5]  }
   0xb   : > { %s970_s15 = scalar_select %p814_p4, 1, 0 }
   0xc   : > { %s971_s16 = scalar_select %p819_p6, 1, 0 }
   0xd   : > { %p824_p8 = pnand %p522_p5, %p97_p7  ;;  %s109_s19 = sshll.u32 %s760_s18, 4  ;;  %s110_s19 = int_to_ptr.vmem [resolvable:$true] %s109_s19 }
   0xe   : > { %s838_s21 = sadd.s32 1, %s758_s12   ;;  %s26_s22 = sadd.s32 1, %s754_s11 }
   0xf   : > { %s972_s17 = scalar_select %p824_p8, 1, 0 }
  0x10   : > { %p577_p9 = pneg %p824_p8  ;;  %s23_s23 = ssub.s32 %s758_s12, %s838_s21 }
  0x11   : > { %s647_s24 = scalar_lea.vmem %s110_s19, 512  ;;  %p655_p5 = scmp.lt.s32.totalorder %s110_s19, %s110_s19 }
  0x12   : > { %p833_p11 = pnand %p577_p9, %p966_p1  ;;  %p648_p13 = scmp.ne.s32.totalorder %s110_s19, %s647_s24 }
  0x13   : > { %p656_p7 = scmp.lt.s32.totalorder %s647_s24, %s647_s24 }
  0x14   : > { %p638_p12 = pneg %p833_p11 }
  0x15   : > { %p657_p10 = por %p656_p7, %p655_p5 }
  0x16   : > { %p650_p0 = pnand %p648_p13, %p638_p12 }
  0x18   : > { %p651_p3 = pneg %p650_p0 }
  0x1a   : > { %p658_p2 = pnand %p657_p10, %p651_p3 }
  0x1c   : > { %661 = shalt.err (!%p658_p2)
}
  0x1d   : > { %s761_s25 = smov 128   ;;  %s762_s26 = smov 8  }
  0x1e   : > { %580 = dma.hbm_to_vmem [thread:$0]  (!%p833_p11), %s964_s1, 512, %s110_s19, [#allocation6], %s761_s25, %s761_s25, %s762_s26  }
  0x1f   : > { %p24_p9 = scmp.eq.s32.totalorder %s23_s23, 0  ;;  %p33_p12 = scmp.ne.s32.totalorder %s754_s11, %s750_s10 }
  0x20   : > { %p34_p10 = scmp.eq.s32.totalorder %s758_s12, 0  ;;  %p590_p2 = scmp.lt.s32.totalorder %s758_s12, 2 }
  0x21   : > { %s855_s29 = scalar_select %p24_p9, %s754_s11, %s26_s22  }
  0x22   : > { %p35_p13 = por %p34_p10, %p33_p12  ;;  %p974_p0 = scmp.eq.s32.totalorder %s805_s13, 1 }
  0x23   : > { %s123_s3 = sand.u32 1, %s754_s11   ;;  %s526_s4 = sshll.u32 %s758_s12, 7 }
  0x24   : > { %p859_p3 = por %p974_p0, %p33_p12  ;;  %s525_s5 = sshll.u32 %s123_s3, 3 }
  0x25   : > { %s868_s8 = scalar_lea.hbm %s963_s0, %s526_s4  ;;  %s127_s14 = scalar_lea.vmem [#allocation2], %s525_s5 }
  0x26   : > { %s975_s30 = scalar_select %p859_p3, 1, 0 }
  0x27   : > { %s134_s18 = sshll.u32 %s127_s14, 4  ;;  %p870_p11 = pnand %p590_p2, %p35_p13  ;;  %s135_s18 = int_to_ptr.vmem [resolvable:$true] %s134_s18 }
  0x28   : > { %s124_s20 = scalar_lea.sflag [#allocation3], %s123_s3  ;;  %s662_s22 = scalar_lea.hbm %s868_s8, 128 }
  0x29   : > { %p663_p5 = scmp.ne.s32.totalorder %s868_s8, %s662_s22  ;;  %p664_p7 = pneg %p870_p11 }
  0x2a   : > { %s667_s25 = scalar_lea.hbm %s963_s0, 256  ;;  %p668_p10 = scmp.lt.s32.totalorder %s868_s8, %s963_s0 }
  0x2b   : > { %p665_p9 = pnand %p664_p7, %p663_p5  ;;  %p669_p2 = scmp.lt.s32.totalorder %s667_s25, %s662_s22 }
  0x2d   : > { %p666_p12 = pneg %p665_p9  ;;  %p670_p13 = por %p669_p2, %p668_p10 }
  0x2f   : > { %p671_p0 = pnand %p670_p13, %p666_p12 }
  0x31   : > { %674 = shalt.err (!%p671_p0)
}
  0x32   : > { %s675_s28 = scalar_lea.vmem %s135_s18, 128  ;;  %s763_s3 = smov [#allocation2]  }
  0x33   : > { %p676_p1 = scmp.ne.s32.totalorder %s135_s18, %s675_s28  ;;  %s680_s4 = sshll.u32 %s763_s3, 4  ;;  %s681_s4 = int_to_ptr.vmem [resolvable:$false] %s680_s4 }
  0x34   : > { %s682_s5 = scalar_lea.vmem %s681_s4, 256  ;;  %p683_p5 = scmp.lt.s32.totalorder %s135_s18, %s681_s4 }
  0x35   : > { %p678_p6 = pnand %p676_p1, %p664_p7  ;;  %p684_p9 = scmp.lt.s32.totalorder %s682_s5, %s675_s28 }
  0x37   : > { %p679_p3 = pneg %p678_p6  ;;  %p685_p4 = por %p684_p9, %p683_p5 }
  0x39   : > { %p686_p8 = pnand %p685_p4, %p679_p3 }
  0x3b   : > { %689 = shalt.err (!%p686_p8)
}
  0x3c   : > { %584 = dma.hbm_to_vmem [thread:$0]  (!%p870_p11), %s868_s8, 128, %s135_s18, %s124_s20  }
  0x3d   : > { %p977_p12 = scmp.ne.s32.totalorder %s972_s17, 0 }
  0x3e   : > { %s891_s6 = sand.u32 (!%p977_p12), 1, %s750_s10   ;;  %p978_p1 = scmp.ne.s32.totalorder (!%p977_p12), %s970_s15, 0 }
  0x3f   : > { %143 = sbr.rel (%p977_p12) target bundleno = 1108 (0x454), region = 28  ;;  %s528_s7 = sshll.u32 (!%p977_p12), %s891_s6, 3 }
  0x40   : > { %s146_s14 = scalar_lea.sflag (!%p977_p12), [#allocation3], %s891_s6  ;;  %s149_s22 = scalar_lea.vmem (!%p977_p12), [#allocation2], %s528_s7 }
  0x44   : > { %733 = dma.done.wait (%p978_p1), %s146_s14, 128  }
  0x45   : > { %735 = vsyncadd (%p978_p1), %s146_s14, 4294967168  ;;  %p979_p4 = scmp.eq.s32.totalorder %s805_s13, 0 }
  0x47   : > { %737 = dma.done.wait (%p979_p4), [#allocation6], 512   ;;  %p980_p6 = pmov %p979_p4 }
  0x48   : > { %v764_v0 = vmov 0.0   ;;  %vm765_vm0 = vmmov 0   ;;  %v178_v1 = vld [vmem:[#allocation5 + $0x18] sm:$0xff]  ;;  %v177_v2 = vld [vmem:[#allocation5 + $0x10] sm:$0xff]  ;;  %v176_v3 = vld [vmem:[#allocation5 + $0x8] sm:$0xff]  ;;  %vm179_vm1 = vcmask 261120   ;;  %v332_v9 = vlaneseq }
  0x49   : > { %739 = vsyncadd (%p980_p6), [#allocation6], 4294966784  ;;  %548 = vmatprep.subr.mxu0 %v764_v0  ;;  %556 = vmatprep.mubr.msk.f32.mxu0 %vm765_vm0, %v764_v0  ;;  %v175_v4 = vld [vmem:[#allocation5] sm:$0xff]  ;;  %v174_v5 = vld [vmem:[%s149_s22] sm:$0xff]  ;;  %s766_s15 = smov 112   ;;  %vm256_vm2 = vcmask 130048  }
  0x4a   : > { %559 = vmatprep.subr.mxu1 %v764_v0  ;;  %561 = vmatprep.mubr.msk.f32.mxu1 %vm765_vm0, %v764_v0  ;;  %v333_v10 = vshrl.u32 %v332_v9, 7  ;;  %v335_v11 = vand.u32 127, %v332_v9  ;;  %vm338_vm4 = vcmask 64512   ;;  %s767_s17 = smov 96   ;;  %s536_s8 = sshll.u32 %s805_s13, 7 }
  0x4b   : > { %549 = vmatpush3.msra.mxu0 %v178_v1  ;;  %s173_s18 = scalar_lea.vmem [#allocation7], %s528_s7  ;;  %s919_s24 = scalar_lea.hbm %s965_s2, %s536_s8 }
  0x4c   : > { %550 = vmatprep.subr.mxu0 %v764_v0  ;;  %vm336_vm3 = vcmp.ge.s32.totalorder %v333_v10, %v335_v11  ;;  %s441_s19 = sshll.u32 %s173_s18, 4  ;;  %s428_s25 = scalar_lea.sflag [#allocation4], %s891_s6  ;;  %s921_s19 = int_to_ptr.vmem [resolvable:$true] %s441_s19 }
  0x4d   : > { %551 = vmatpush3.msra.mxu0 %v177_v2  ;;  %s690_s26 = scalar_lea.vmem %s921_s19, 128  ;;  %p981_p3 = scmp.ne.s32.totalorder %s975_s30, 0 }
  0x4e   : > { %552 = vmatprep.subr.mxu0 %v764_v0  ;;  %p691_p8 = scmp.ne.s32.totalorder %s921_s19, %s690_s26  ;;  %s768_s13 = smov [#allocation7]  }
  0x4f   : > { %553 = vmatpush3.msra.mxu0 %v176_v3  ;;  %s694_s27 = sshll.u32 %s768_s13, 4  ;;  %s695_s27 = int_to_ptr.vmem [resolvable:$false] %s694_s27 }
  0x50   : > { %554 = vmatprep.subr.mxu0 %v764_v0  ;;  %p692_p11 = pnand %p691_p8, %p981_p3  ;;  %s696_s28 = scalar_lea.vmem %s695_s27, 256 }
  0x51   : > { %555 = vmatpush3.msra.mxu0 %v175_v4  ;;  %p697_p10 = scmp.lt.s32.totalorder %s921_s19, %s695_s27  ;;  %p698_p2 = scmp.lt.s32.totalorder %s696_s28, %s690_s26 }
  0x52   : > { %557 = vmatmul.mubr.msk.f32.vlgmr.msra.gmra.mxu0 %vm179_vm1, %v174_v5  ;;  %p693_p7 = pneg %p692_p11 }
  0x53   : > { %p699_p13 = por %p698_p2, %p697_p10 }
  0x55   : > { %p700_p0 = pnand %p699_p13, %p693_p7 }
 0x112   : > { %v249_v6 = vpop.f32.mrf.mxu0 }
 0x113   : > { %254 = vrot.lane.b32.xlu0 %v249_v6, %s766_s15 }
 0x114   : > { %v558_v7 = vpop.f32.mrf.mxu0 }
 0x185   : > { %v255_v8 = vpop.permute.xlu0 %254 }
 0x186   : > { %560 = vmatpush3.xpose.msk.msra.mxu1 %vm256_vm2, %v255_v8 }
 0x187   : > { %564 = vmatprep.subr.mxu1 %v764_v0 }
 0x189   : > { %562 = vmatmul.mubr.msk.f32.vlgmr.msra.gmra.mxu1 %vm256_vm2, %v249_v6 }
 0x18a   : > { %566 = vmatprep.mubr.msk.f32.mxu1 %vm765_vm0, %v764_v0 }
 0x249   : > { %v327_v12 = vpop.f32.mrf.mxu1 }
 0x24a   : > { %v331_v13 = vmul.f32 0.17677669, %v327_v12 }
 0x24b   : > { %v563_v14 = vpop.f32.mrf.mxu1 }
 0x24c   : > { %v337_v15 = vsel %vm336_vm3, %v331_v13, -1e+30 }
 0x24d   : > { %v339_v16 = vsel %vm338_vm4, %v337_v15, -inf }
 0x24e   : > { %340 = vmax.xlane.f32.xlu0 %v339_v16 }
 0x2d7   : > { %v341_v17 = vpop.xlane.xlu0 %340 }
 0x2d8   : > { %v342_v18 = vsub.f32 %v337_v15, %v341_v17 }
 0x2da   : > { %v343_v19 = vmul.f32 1.442695, %v342_v18 }
 0x2dc   : > { %632 = vpow2.f32 %v343_v19 }
 0x2e9   : > { %v633_v20 = vpop.eup %632 }
 0x2ea   : > { %v345_v21 = vsel %vm338_vm4, %v633_v20, 0.0 }
 0x2eb   : > { %346 = vadd.xlane.f32.xlu1 %v345_v21 }
 0x2fc   : > { %350 = vrot.lane.b32.xlu1 %v249_v6, %s767_s17 }
 0x374   : > { %v347_v22 = vpop.xlane.xlu1 %346 }
 0x375   : > { %634 = vrcp.f32 %v347_v22 }
 0x378   : > { %v351_v23 = vpop.permute.xlu1 %350 }
 0x379   : > { %565 = vmatpush3.msra.mxu1 %v351_v23 }
 0x382   : > { %v635_v24 = vpop.eup %634 }
 0x383   : > { %v349_v25 = vmul.f32 %v635_v24, %v633_v20 }
 0x385   : > { %567 = vmatmul.mubr.msk.f32.vlgmr.msra.gmra.mxu1 %vm338_vm4, %v349_v25 }
 0x445   : > { %v422_v26 = vpop.f32.mrf.mxu1 }
 0x446   : > { %426 = vst.msk [vmem:[%s173_s18] sm:$0xff] %vm256_vm2, %v422_v26 }
 0x447   : > { %v568_v27 = vpop.f32.mrf.mxu1 }
 0x448   : > { %703 = shalt.err (!%p700_p0)
}
 0x449   : > { %s704_s3 = scalar_lea.hbm %s919_s24, 128  ;;  %s708_s6 = scalar_lea.hbm %s965_s2, 256 }
 0x44a   : > { %p705_p5 = scmp.ne.s32.totalorder %s919_s24, %s704_s3  ;;  %p709_p1 = scmp.lt.s32.totalorder %s919_s24, %s965_s2 }
 0x44b   : > { %p710_p4 = scmp.lt.s32.totalorder %s708_s6, %s704_s3 }
 0x44c   : > { %p706_p9 = pnand %p705_p5, %p981_p3 }
 0x44d   : > { %p711_p6 = por %p710_p4, %p709_p1 }
 0x44e   : > { %p707_p12 = pneg %p706_p9 }
 0x450   : > { %p712_p8 = pnand %p711_p6, %p707_p12 }
 0x452   : > { %715 = shalt.err (!%p712_p8)
}
 0x453   : > { %575 = dma.vmem_to_hbm [thread:$0]  (%p981_p3), %s921_s19, 128, %s919_s24, %s428_s25  }
 0x454 PF: > { %s453_s22 = sand.u32 1, %s746_s9   ;;  %p982_p11 = scmp.ne.s32.totalorder %s971_s16, 0 }
 0x455   : > { %p983_p7 = scmp.ge.s32.totalorder %s758_s12, 2  ;;  %s454_s15 = scalar_lea.sflag [#allocation4], %s453_s22 }
 0x457   : > { %p586_p10 = pnand %p983_p7, %p982_p11 }
 0x459   : > { %p587_p2 = pneg %p586_p10 }
 0x45b   : > { %741 = dma.done.wait (%p587_p2), %s454_s15, 128  }
 0x45c   : > { %743 = vsyncadd (%p587_p2), %s454_s15, 4294967168  ;;  %p16_p13 = scmp.ge.s32.totalorder %s838_s21, 4   ;;  %s984_s9 = smov %s750_s10 }
 0x45d   : > { %s985_s10 = smov %s754_s11  ;;  %s986_s11 = smov %s855_s29 }
 0x45e   : > { %s987_s12 = smov %s838_s21  ;;  %18 = sbr.rel (!%p16_p13) target bundleno = 6 (0x6), region = 77 }
 0x463   :  { %459 = vsyncpa [#allocation3], 1 }
 0x464   :  { %461 = vsyncpa [#allocation3 + $0x1], 1 }
 0x465   :  { %462 = vsyncpa [#allocation6], 1 }
 0x466   :  { %463 = vsyncpa [#allocation4], 1 }
 0x467   :  { %465 = vsyncpa [#allocation4 + $0x1], 1 }

</bundles_post_ra>
